<compile_context>
chip_gen: v5e
topology: v5e:2x2
jax: 0.10.0
libtpu: 0.0.40
codegen_flags: <defaults>
</compile_context>

<pallas_src>
import functools

import numpy as np
import jax
import jax.numpy as jnp
from jax import lax
from jax.experimental import pallas as pl
from jax.experimental.pallas import tpu as pltpu


IN_DIM = 32
MEM_DIM = 32
N_MAX = 8      # max children per node (missing children -> all-zero NULL slot)
TILE_B = 8     # nodes per grid step (sublane-dense row tile)


# ---------------------------------------------------------------------------
# Pallas kernel: one row tile of TILE_B nodes of a single tree level.
# ---------------------------------------------------------------------------
def _level_kernel(x_ref, chc_ref, chh_ref, wx_ref, bx_ref, wh_ref, bh_ref,
                  out_ref, *, mem_dim, n_max, tile_b):
    M = mem_dim
    x = x_ref[...]            # (TB, in_dim)          f32
    ch_c = chc_ref[...]       # (TB*N_MAX, M)         children, flat, zero-padded
    ch_h = chh_ref[...]       # (TB*N_MAX, M)

    # x-path: fused [ioux | fx] -> lane-dense (TB, 4M = 128), bias included.
    xz = jnp.dot(x, wx_ref[...], preferred_element_type=jnp.float32) + bx_ref[...]

    # h-path: fused [iouh | fh], computed per child row -> (TB*N_MAX, 4M).
    # (summing the per-child iouh contributions afterwards == iouh(child_h_sum))
    hz = jnp.dot(ch_h, wh_ref[...], preferred_element_type=jnp.float32)

    # 0/1 group-sum (S) and row-repeat (ST) matrices, built in-register; the
    # per-node child reductions then run on the MXU instead of XLU shuffles.
    r_s = lax.broadcasted_iota(jnp.int32, (tile_b, tile_b * n_max), 0)
    c_s = lax.broadcasted_iota(jnp.int32, (tile_b, tile_b * n_max), 1)
    S = jnp.logical_and(c_s >= r_s * n_max,
                        c_s < (r_s + 1) * n_max).astype(jnp.float32)   # (TB, TB*N)
    r_t = lax.broadcasted_iota(jnp.int32, (tile_b * n_max, tile_b), 0)
    c_t = lax.broadcasted_iota(jnp.int32, (tile_b * n_max, tile_b), 1)
    ST = jnp.logical_and(r_t >= c_t * n_max,
                         r_t < (c_t + 1) * n_max).astype(jnp.float32)  # (TB*N, TB)

    bh = bh_ref[...]                                                    # (1, 4M)
    hz_sum = jnp.dot(S, hz, preferred_element_type=jnp.float32)         # (TB, 4M)

    # Gates (zero-padded child rows contribute 0 to hz_sum -> exact semantics).
    iou = xz[:, :3 * M] + hz_sum[:, :3 * M] + bh[:, :3 * M]             # (TB, 3M)
    i = jax.nn.sigmoid(iou[:, :M])
    o = jax.nn.sigmoid(iou[:, M:2 * M])
    u = jnp.tanh(iou[:, 2 * M:3 * M])

    # Forget gate per child: f = sigmoid(child_h @ W_fh + b_fh + x @ W_fx + b_fx)
    fxb = xz[:, 3 * M:] + bh[:, 3 * M:]                                  # (TB, M)
    fx_rows = jnp.dot(ST, fxb, preferred_element_type=jnp.float32)       # (TB*N, M)
    f = jax.nn.sigmoid(hz[:, 3 * M:] + fx_rows)                          # (TB*N, M)
    fc_sum = jnp.dot(S, f * ch_c, preferred_element_type=jnp.float32)    # (TB, M)

    c = i * u + fc_sum
    h = o * jnp.tanh(c)
    out_ref[...] = jnp.concatenate([c, h], axis=-1)                      # (TB, 2M)


def _batched_node_forward(x, child_c, child_h, wx, bx, wh, bh,
                          *, mem_dim, n_max, tile_b):
    """One pallas_call for a whole (padded) tree level of B nodes."""
    B, in_dim = x.shape
    assert B % tile_b == 0
    ch_c2 = child_c.reshape(B * n_max, mem_dim)
    ch_h2 = child_h.reshape(B * n_max, mem_dim)
    kernel = functools.partial(_level_kernel, mem_dim=mem_dim,
                               n_max=n_max, tile_b=tile_b)
    return pl.pallas_call(
        kernel,
        out_shape=jax.ShapeDtypeStruct((B, 2 * mem_dim), jnp.float32),
        grid=(B // tile_b,),
        in_specs=[
            pl.BlockSpec((tile_b, in_dim), lambda i: (i, 0)),
            pl.BlockSpec((tile_b * n_max, mem_dim), lambda i: (i, 0)),
            pl.BlockSpec((tile_b * n_max, mem_dim), lambda i: (i, 0)),
            # weights/biases: constant block index -> stay VMEM-resident
            pl.BlockSpec((in_dim, 4 * mem_dim), lambda i: (0, 0)),
            pl.BlockSpec((1, 4 * mem_dim), lambda i: (0, 0)),
            pl.BlockSpec((mem_dim, 4 * mem_dim), lambda i: (0, 0)),
            pl.BlockSpec((1, 4 * mem_dim), lambda i: (0, 0)),
        ],
        out_specs=pl.BlockSpec((tile_b, 2 * mem_dim), lambda i: (i, 0)),
        compiler_params=pltpu.CompilerParams(
            dimension_semantics=("parallel",)),   # 2 TCs on v7x; no-op on v5e/v6e
    )(x, ch_c2, ch_h2, wx, bx, wh, bh)


# ---------------------------------------------------------------------------
# One jitted step per tree level: gather children from the device-resident
# state tables, run the batched kernel, scatter results back.
# ---------------------------------------------------------------------------
@jax.jit
def _level_step(x_ids, out_ids, child_idx, inputs, c_tab, h_tab, wx, bx, wh, bh):
    x = jnp.take(inputs, x_ids, axis=0)                 # (Bp, in_dim)
    child_c = jnp.take(c_tab, child_idx, axis=0)        # (Bp, N_MAX, mem_dim)
    child_h = jnp.take(h_tab, child_idx, axis=0)
    out = _batched_node_forward(x, child_c, child_h, wx, bx, wh, bh,
                                mem_dim=MEM_DIM, n_max=N_MAX, tile_b=TILE_B)
    c_tab = c_tab.at[out_ids].set(out[:, :MEM_DIM])
    h_tab = h_tab.at[out_ids].set(out[:, MEM_DIM:])
    return c_tab, h_tab


# ---------------------------------------------------------------------------
# Host-side scheduling only (no per-node kernel launches).
# ---------------------------------------------------------------------------
class Tree:
    def __init__(self, node_id, children=()):
        self.id = node_id
        self.children = list(children)
        self.num_children = len(self.children)
        self.state = None


def build_level_schedule(root, num_nodes):
    """Group nodes by height (children strictly lower) and pad to TILE_B rows."""
    levels = {}

    def height(node):
        assert node.num_children <= N_MAX
        h = 0 if not node.children else 1 + max(height(c) for c in node.children)
        levels.setdefault(h, []).append(node)
        return h

    height(root)
    null_slot = num_nodes          # all-zero row for missing children (read-only)
    trash_slot = num_nodes + 1     # sink row for padded batch rows
    max_b = max(len(v) for v in levels.values())
    padded_b = ((max_b + TILE_B - 1) // TILE_B) * TILE_B  # same shape -> 1 compile

    sched = []
    for hgt in sorted(levels):
        nodes = levels[hgt]
        x_ids = np.zeros((padded_b,), np.int32)
        out_ids = np.full((padded_b,), trash_slot, np.int32)
        child_idx = np.full((padded_b, N_MAX), null_slot, np.int32)
        for r, node in enumerate(nodes):
            x_ids[r] = node.id
            out_ids[r] = node.id
            for k, ch in enumerate(node.children):
                child_idx[r, k] = ch.id
        sched.append((jnp.asarray(x_ids), jnp.asarray(out_ids),
                      jnp.asarray(child_idx)))
    return sched, num_nodes + 2


def tree_summarize_pallas(root, inputs, fused, num_nodes):
    sched, table_rows = build_level_schedule(root, num_nodes)
    c_tab = jnp.zeros((table_rows, MEM_DIM), jnp.float32)
    h_tab = jnp.zeros((table_rows, MEM_DIM), jnp.float32)
    for x_ids, out_ids, child_idx in sched:
        c_tab, h_tab = _level_step(x_ids, out_ids, child_idx, inputs,
                                   c_tab, h_tab,
                                   fused["wx"], fused["bx"],
                                   fused["wh"], fused["bh"])
    return c_tab, h_tab


# ---------------------------------------------------------------------------
# Plain-JAX per-node reference (mirrors torch node_forward / forward exactly).
# ---------------------------------------------------------------------------
def node_forward_ref(x, child_c, child_h, p):
    child_h_sum = jnp.sum(child_h, axis=0, keepdims=True)
    iou = (x @ p["w_ioux"] + p["b_ioux"]) + (child_h_sum @ p["w_iouh"] + p["b_iouh"])
    i, o, u = jnp.split(iou, 3, axis=1)
    i, o, u = jax.nn.sigmoid(i), jax.nn.sigmoid(o), jnp.tanh(u)
    f = jax.nn.sigmoid((child_h @ p["w_fh"] + p["b_fh"]) + (x @ p["w_fx"] + p["b_fx"]))
    fc = f * child_c
    c = i * u + jnp.sum(fc, axis=0, keepdims=True)
    h = o * jnp.tanh(c)
    return c, h


def tree_summarize_ref(tree, inputs, params):
    for child in tree.children:
        tree_summarize_ref(child, inputs, params)
    if tree.num_children == 0:
        child_c = jnp.zeros((1, MEM_DIM), jnp.float32)
        child_h = jnp.zeros((1, MEM_DIM), jnp.float32)
    else:
        child_c = jnp.concatenate([ch.state[0] for ch in tree.children], axis=0)
        child_h = jnp.concatenate([ch.state[1] for ch in tree.children], axis=0)
    x = inputs[tree.id].reshape(1, IN_DIM).astype(jnp.float32)
    tree.state = node_forward_ref(x, child_c, child_h, params)
    return tree.state


# ---------------------------------------------------------------------------
# Parameters (Linear weights stored transposed: y = x @ W + b).
# ---------------------------------------------------------------------------
def init_params(key, in_dim, mem_dim):
    ks = jax.random.split(key, 8)
    s = 0.1
    return {
        "w_ioux": s * jax.random.normal(ks[0], (in_dim, 3 * mem_dim), jnp.float32),
        "b_ioux": s * jax.random.normal(ks[1], (1, 3 * mem_dim), jnp.float32),
        "w_iouh": s * jax.random.normal(ks[2], (mem_dim, 3 * mem_dim), jnp.float32),
        "b_iouh": s * jax.random.normal(ks[3], (1, 3 * mem_dim), jnp.float32),
        "w_fx":   s * jax.random.normal(ks[4], (in_dim, mem_dim), jnp.float32),
        "b_fx":   s * jax.random.normal(ks[5], (1, mem_dim), jnp.float32),
        "w_fh":   s * jax.random.normal(ks[6], (mem_dim, mem_dim), jnp.float32),
        "b_fh":   s * jax.random.normal(ks[7], (1, mem_dim), jnp.float32),
    }


def fuse_params(p):
    return {
        "wx": jnp.concatenate([p["w_ioux"], p["w_fx"]], axis=1),   # (in_dim, 4M)
        "bx": jnp.concatenate([p["b_ioux"], p["b_fx"]], axis=1),   # (1, 4M)
        "wh": jnp.concatenate([p["w_iouh"], p["w_fh"]], axis=1),   # (mem_dim, 4M)
        "bh": jnp.concatenate([p["b_iouh"], p["b_fh"]], axis=1),   # (1, 4M)
    }


if __name__ == "__main__":
    key = jax.random.PRNGKey(0)
    k_param, k_inp = jax.random.split(key)

    params = init_params(k_param, IN_DIM, MEM_DIM)
    fused = fuse_params(params)

    # Small tree: root(0) -> {1, 2}; node 1 -> {3, 4}; nodes 2, 3, 4 are leaves.
    tree_p = Tree(0, [Tree(1, [Tree(3), Tree(4)]), Tree(2)])
    tree_r = Tree(0, [Tree(1, [Tree(3), Tree(4)]), Tree(2)])
    num_nodes = 5
    inputs = jax.random.normal(k_inp, (num_nodes, IN_DIM), jnp.float32)

    c_tab, h_tab = tree_summarize_pallas(tree_p, inputs, fused, num_nodes)
    c_tab = jax.block_until_ready(c_tab)
    h_tab = jax.block_until_ready(h_tab)

    tree_summarize_ref(tree_r, inputs, params)

    def collect(node, acc):
        acc.append(node)
        for ch in node.children:
            collect(ch, acc)
        return acc

    for node in collect(tree_r, []):
        c_ref, h_ref = node.state
        assert jnp.allclose(c_tab[node.id:node.id + 1], c_ref, atol=1e-4, rtol=1e-4), \
            f"c mismatch at node {node.id}"
        assert jnp.allclose(h_tab[node.id:node.id + 1], h_ref, atol=1e-4, rtol=1e-4), \
            f"h mismatch at node {node.id}"

    root_c = c_tab[tree_p.id:tree_p.id + 1]
    root_h = h_tab[tree_p.id:tree_p.id + 1]
    assert root_c.shape == (1, MEM_DIM) and root_h.shape == (1, MEM_DIM)

    print("KERNEL_OK")
</pallas_src>

<mosaic_0001>
module attributes {stable_mosaic.version = 11 : i64} {
  func.func @_level_kernel(%arg0: i32, %arg1: memref<8x32xf32, #tpu.memory_space<vmem>>, %arg2: memref<64x32xf32, #tpu.memory_space<vmem>>, %arg3: memref<64x32xf32, #tpu.memory_space<vmem>>, %arg4: memref<32x128xf32, #tpu.memory_space<vmem>>, %arg5: memref<1x128xf32, #tpu.memory_space<vmem>>, %arg6: memref<32x128xf32, #tpu.memory_space<vmem>>, %arg7: memref<1x128xf32, #tpu.memory_space<vmem>>, %arg8: memref<8x64xf32, #tpu.memory_space<vmem>>) attributes {dimension_semantics = [#tpu.dimension_semantics<parallel>], iteration_bounds = array<i64: 1>, scalar_prefetch = 0 : i64, scratch_operands = 0 : i64, tpu.core_type = #tpu.core_type<tc>, window_params = [{transform_indices = @transform_0, window_bounds = array<i64: 8, 32>}, {transform_indices = @transform_1, window_bounds = array<i64: 64, 32>}, {transform_indices = @transform_2, window_bounds = array<i64: 64, 32>}, {pipeline_mode = #tpu.pipeline_mode<synchronous>, transform_indices = @transform_3, window_bounds = array<i64: 32, 128>}, {pipeline_mode = #tpu.pipeline_mode<synchronous>, transform_indices = @transform_4, window_bounds = array<i64: 1, 128>}, {pipeline_mode = #tpu.pipeline_mode<synchronous>, transform_indices = @transform_5, window_bounds = array<i64: 32, 128>}, {pipeline_mode = #tpu.pipeline_mode<synchronous>, transform_indices = @transform_6, window_bounds = array<i64: 1, 128>}, {transform_indices = @transform_7, window_bounds = array<i64: 8, 64>}]} {
    %c0 = arith.constant 0 : index
    %c0_0 = arith.constant 0 : index
    %0 = vector.load %arg1[%c0, %c0_0] : memref<8x32xf32, #tpu.memory_space<vmem>>, vector<8x32xf32>
    %c0_1 = arith.constant 0 : index
    %c0_2 = arith.constant 0 : index
    %1 = vector.load %arg2[%c0_1, %c0_2] : memref<64x32xf32, #tpu.memory_space<vmem>>, vector<64x32xf32>
    %c0_3 = arith.constant 0 : index
    %c0_4 = arith.constant 0 : index
    %2 = vector.load %arg3[%c0_3, %c0_4] : memref<64x32xf32, #tpu.memory_space<vmem>>, vector<64x32xf32>
    %c0_5 = arith.constant 0 : index
    %c0_6 = arith.constant 0 : index
    %3 = vector.load %arg4[%c0_5, %c0_6] : memref<32x128xf32, #tpu.memory_space<vmem>>, vector<32x128xf32>
    %cst = arith.constant dense<0.000000e+00> : vector<8x128xf32>
    %4 = tpu.matmul %0, %3, %cst {dimension_numbers = #tpu.dot_dimension_numbers<[1], [0], [0], [1], [0, 0, 1, 1], [], []>} : vector<8x32xf32>, vector<32x128xf32>, vector<8x128xf32> -> vector<8x128xf32>
    %c0_7 = arith.constant 0 : index
    %c0_8 = arith.constant 0 : index
    %5 = vector.load %arg5[%c0_7, %c0_8] : memref<1x128xf32, #tpu.memory_space<vmem>>, vector<1x128xf32>
    %6 = vector.broadcast %5 : vector<1x128xf32> to vector<8x128xf32>
    %7 = arith.addf %4, %6 : vector<8x128xf32>
    %c0_9 = arith.constant 0 : index
    %c0_10 = arith.constant 0 : index
    %8 = vector.load %arg6[%c0_9, %c0_10] : memref<32x128xf32, #tpu.memory_space<vmem>>, vector<32x128xf32>
    %cst_11 = arith.constant dense<0.000000e+00> : vector<64x128xf32>
    %9 = tpu.matmul %2, %8, %cst_11 {dimension_numbers = #tpu.dot_dimension_numbers<[1], [0], [0], [1], [0, 0, 1, 1], [], []>} : vector<64x32xf32>, vector<32x128xf32>, vector<64x128xf32> -> vector<64x128xf32>
    %10 = tpu.iota {dimensions = array<i32: 0>} : vector<8x64xi32>
    %11 = tpu.iota {dimensions = array<i32: 1>} : vector<8x64xi32>
    %c8_i32 = arith.constant 8 : i32
    %12 = vector.broadcast %c8_i32 : i32 to vector<8x64xi32>
    %13 = arith.muli %10, %12 : vector<8x64xi32>
    %14 = arith.cmpi sge, %11, %13 : vector<8x64xi32>
    %c1_i32 = arith.constant 1 : i32
    %15 = vector.broadcast %c1_i32 : i32 to vector<8x64xi32>
    %16 = arith.addi %10, %15 : vector<8x64xi32>
    %c8_i32_12 = arith.constant 8 : i32
    %17 = vector.broadcast %c8_i32_12 : i32 to vector<8x64xi32>
    %18 = arith.muli %16, %17 : vector<8x64xi32>
    %19 = arith.cmpi slt, %11, %18 : vector<8x64xi32>
    %20 = arith.andi %14, %19 : vector<8x64xi1>
    %21 = arith.extui %20 : vector<8x64xi1> to vector<8x64xi32>
    %22 = arith.sitofp %21 : vector<8x64xi32> to vector<8x64xf32>
    %23 = tpu.iota {dimensions = array<i32: 0>} : vector<64x8xi32>
    %24 = tpu.iota {dimensions = array<i32: 1>} : vector<64x8xi32>
    %c8_i32_13 = arith.constant 8 : i32
    %25 = vector.broadcast %c8_i32_13 : i32 to vector<64x8xi32>
    %26 = arith.muli %24, %25 : vector<64x8xi32>
    %27 = arith.cmpi sge, %23, %26 : vector<64x8xi32>
    %c1_i32_14 = arith.constant 1 : i32
    %28 = vector.broadcast %c1_i32_14 : i32 to vector<64x8xi32>
    %29 = arith.addi %24, %28 : vector<64x8xi32>
    %c8_i32_15 = arith.constant 8 : i32
    %30 = vector.broadcast %c8_i32_15 : i32 to vector<64x8xi32>
    %31 = arith.muli %29, %30 : vector<64x8xi32>
    %32 = arith.cmpi slt, %23, %31 : vector<64x8xi32>
    %33 = arith.andi %27, %32 : vector<64x8xi1>
    %34 = arith.extui %33 : vector<64x8xi1> to vector<64x8xi32>
    %35 = arith.sitofp %34 : vector<64x8xi32> to vector<64x8xf32>
    %c0_16 = arith.constant 0 : index
    %c0_17 = arith.constant 0 : index
    %36 = vector.load %arg7[%c0_16, %c0_17] : memref<1x128xf32, #tpu.memory_space<vmem>>, vector<1x128xf32>
    %cst_18 = arith.constant dense<0.000000e+00> : vector<8x128xf32>
    %37 = tpu.matmul %22, %9, %cst_18 {dimension_numbers = #tpu.dot_dimension_numbers<[1], [0], [0], [1], [0, 0, 1, 1], [], []>} : vector<8x64xf32>, vector<64x128xf32>, vector<8x128xf32> -> vector<8x128xf32>
    %38 = vector.extract_strided_slice %7 {offsets = [0, 0], sizes = [8, 96], strides = [1, 1]} : vector<8x128xf32> to vector<8x96xf32>
    %39 = vector.extract_strided_slice %37 {offsets = [0, 0], sizes = [8, 96], strides = [1, 1]} : vector<8x128xf32> to vector<8x96xf32>
    %40 = arith.addf %38, %39 : vector<8x96xf32>
    %41 = vector.extract_strided_slice %36 {offsets = [0, 0], sizes = [1, 96], strides = [1, 1]} : vector<1x128xf32> to vector<1x96xf32>
    %42 = vector.broadcast %41 : vector<1x96xf32> to vector<8x96xf32>
    %43 = arith.addf %40, %42 : vector<8x96xf32>
    %44 = vector.extract_strided_slice %43 {offsets = [0, 0], sizes = [8, 32], strides = [1, 1]} : vector<8x96xf32> to vector<8x32xf32>
    %45 = arith.negf %44 : vector<8x32xf32>
    %46 = math.exp %45 : vector<8x32xf32>
    %cst_19 = arith.constant 1.000000e+00 : f32
    %47 = vector.broadcast %cst_19 : f32 to vector<8x32xf32>
    %48 = arith.addf %47, %46 : vector<8x32xf32>
    %49 = arith.divf %47, %48 : vector<8x32xf32>
    %50 = vector.extract_strided_slice %43 {offsets = [0, 32], sizes = [8, 32], strides = [1, 1]} : vector<8x96xf32> to vector<8x32xf32>
    %51 = arith.negf %50 : vector<8x32xf32>
    %52 = math.exp %51 : vector<8x32xf32>
    %cst_20 = arith.constant 1.000000e+00 : f32
    %53 = vector.broadcast %cst_20 : f32 to vector<8x32xf32>
    %54 = arith.addf %53, %52 : vector<8x32xf32>
    %55 = arith.divf %53, %54 : vector<8x32xf32>
    %56 = vector.extract_strided_slice %43 {offsets = [0, 64], sizes = [8, 32], strides = [1, 1]} : vector<8x96xf32> to vector<8x32xf32>
    %57 = math.tanh %56 : vector<8x32xf32>
    %58 = vector.extract_strided_slice %7 {offsets = [0, 96], sizes = [8, 32], strides = [1, 1]} : vector<8x128xf32> to vector<8x32xf32>
    %59 = vector.extract_strided_slice %36 {offsets = [0, 96], sizes = [1, 32], strides = [1, 1]} : vector<1x128xf32> to vector<1x32xf32>
    %60 = vector.broadcast %59 : vector<1x32xf32> to vector<8x32xf32>
    %61 = arith.addf %58, %60 : vector<8x32xf32>
    %cst_21 = arith.constant dense<0.000000e+00> : vector<64x32xf32>
    %62 = tpu.matmul %35, %61, %cst_21 {dimension_numbers = #tpu.dot_dimension_numbers<[1], [0], [0], [1], [0, 0, 1, 1], [], []>} : vector<64x8xf32>, vector<8x32xf32>, vector<64x32xf32> -> vector<64x32xf32>
    %63 = vector.extract_strided_slice %9 {offsets = [0, 96], sizes = [64, 32], strides = [1, 1]} : vector<64x128xf32> to vector<64x32xf32>
    %64 = arith.addf %63, %62 : vector<64x32xf32>
    %65 = arith.negf %64 : vector<64x32xf32>
    %66 = math.exp %65 : vector<64x32xf32>
    %cst_22 = arith.constant 1.000000e+00 : f32
    %67 = vector.broadcast %cst_22 : f32 to vector<64x32xf32>
    %68 = arith.addf %67, %66 : vector<64x32xf32>
    %69 = arith.divf %67, %68 : vector<64x32xf32>
    %70 = arith.mulf %69, %1 : vector<64x32xf32>
    %cst_23 = arith.constant dense<0.000000e+00> : vector<8x32xf32>
    %71 = tpu.matmul %22, %70, %cst_23 {dimension_numbers = #tpu.dot_dimension_numbers<[1], [0], [0], [1], [0, 0, 1, 1], [], []>} : vector<8x64xf32>, vector<64x32xf32>, vector<8x32xf32> -> vector<8x32xf32>
    %72 = arith.mulf %49, %57 : vector<8x32xf32>
    %73 = arith.addf %72, %71 : vector<8x32xf32>
    %74 = math.tanh %73 : vector<8x32xf32>
    %75 = arith.mulf %55, %74 : vector<8x32xf32>
    %76 = tpu.concatenate %73, %75 in 1 : vector<8x32xf32>, vector<8x32xf32> -> vector<8x64xf32>
    %c0_24 = arith.constant 0 : index
    %c0_25 = arith.constant 0 : index
    %77 = vector.load %arg8[%c0_24, %c0_25] : memref<8x64xf32, #tpu.memory_space<vmem>>, vector<8x64xf32>
    tpu.vector_store %arg8[%c0_24, %c0_25], %76 {strides = array<i32>} : memref<8x64xf32, #tpu.memory_space<vmem>>, vector<8x64xf32>,
    return
  }
  func.func @transform_0(%arg0: i32) -> (i32, i32) {
    %c0_i32 = arith.constant 0 : i32
    %c0_i32_0 = arith.constant 0 : i32
    return %arg0, %c0_i32 : i32, i32
  }
  func.func @transform_1(%arg0: i32) -> (i32, i32) {
    %c0_i32 = arith.constant 0 : i32
    %c0_i32_0 = arith.constant 0 : i32
    return %arg0, %c0_i32 : i32, i32
  }
  func.func @transform_2(%arg0: i32) -> (i32, i32) {
    %c0_i32 = arith.constant 0 : i32
    %c0_i32_0 = arith.constant 0 : i32
    return %arg0, %c0_i32 : i32, i32
  }
  func.func @transform_3(%arg0: i32) -> (i32, i32) {
    %c0_i32 = arith.constant 0 : i32
    %c0_i32_0 = arith.constant 0 : i32
    %c0_i32_1 = arith.constant 0 : i32
    return %c0_i32, %c0_i32_0 : i32, i32
  }
  func.func @transform_4(%arg0: i32) -> (i32, i32) {
    %c0_i32 = arith.constant 0 : i32
    %c0_i32_0 = arith.constant 0 : i32
    %c0_i32_1 = arith.constant 0 : i32
    return %c0_i32, %c0_i32_0 : i32, i32
  }
  func.func @transform_5(%arg0: i32) -> (i32, i32) {
    %c0_i32 = arith.constant 0 : i32
    %c0_i32_0 = arith.constant 0 : i32
    %c0_i32_1 = arith.constant 0 : i32
    return %c0_i32, %c0_i32_0 : i32, i32
  }
  func.func @transform_6(%arg0: i32) -> (i32, i32) {
    %c0_i32 = arith.constant 0 : i32
    %c0_i32_0 = arith.constant 0 : i32
    %c0_i32_1 = arith.constant 0 : i32
    return %c0_i32, %c0_i32_0 : i32, i32
  }
  func.func @transform_7(%arg0: i32) -> (i32, i32) {
    %c0_i32 = arith.constant 0 : i32
    %c0_i32_0 = arith.constant 0 : i32
    return %arg0, %c0_i32 : i32, i32
  }
}

</mosaic_0001>

<bundles_post_ra>
// kernel: _level_step.1
= control target key start
LH: loop header
LB: loop body
LE: loop exit
PB: predicated region body
PF: predicated region fallthrough
CT: control target
= control target key end

     0   :  { %vm51_vm0 = vcmask 261120   ;;  %v144_v27 = vlaneseq  ;;  %v738_v36 = vmov 0.0   ;;  %vm207_vm4 = vcmask 523264   ;;  %s1112_s3 = inlined_call_operand.vmem [shape: f32[32,128], index: 3, kind: input, shape index: {}]   ;;  %s1113_s5 = inlined_call_operand.vmem [shape: f32[32,128], index: 5, kind: input, shape index: {}]   ;;  %s1114_s0 = inlined_call_operand.vmem [shape: f32[8,32], index: 0, kind: input, shape index: {}]   ;;  %s1115_s2 = inlined_call_operand.vmem [shape: f32[64,32], index: 2, kind: input, shape index: {}]   ;;  %s1116_s4 = inlined_call_operand.vmem [shape: f32[1,128], index: 4, kind: input, shape index: {}]   ;;  %s1117_s6 = inlined_call_operand.vmem [shape: f32[1,128], index: 6, kind: input, shape index: {}]   ;;  %s1118_s1 = inlined_call_operand.vmem [shape: f32[64,32], index: 1, kind: input, shape index: {}]   ;;  %s1119_s7 = inlined_call_operand.vmem [shape: f32[8,64], index: 7, kind: output, shape index: {}]  }
   0x1   :  { %v46_v0 = vld [vmem:[%s1112_s3 + $0x18] sm:$0xff]  ;;  %v45_v2 = vld [vmem:[%s1112_s3 + $0x10] sm:$0xff]  ;;  %v44_v4 = vld [vmem:[%s1112_s3 + $0x8] sm:$0xff]  ;;  %vm261_vm8 = vcmask 64512  }
   0x2   :  { %v78_v1 = vld [vmem:[%s1113_s5 + $0x18] sm:$0xff]  ;;  %67 = vmatpush.msra.mxu0 %v46_v0  ;;  %v77_v3 = vld [vmem:[%s1113_s5 + $0x10] sm:$0xff]  ;;  %v76_v5 = vld [vmem:[%s1113_s5 + $0x8] sm:$0xff]  ;;  %v864_v28 = vshrl.u32 %v144_v27, 7  ;;  %v147_v32 = vand.u32 127, %v144_v27 }
   0x3   :  { %115 = vmatpush.msra.mxu1 %v78_v1  ;;  %666 = vmatpush.msra.mxu2 %v78_v1  ;;  %v43_v6 = vld [vmem:[%s1112_s3] sm:$0xff]  ;;  %v40_v10 = vld [vmem:[%s1115_s2 + $0x28] sm:$0xff]  ;;  %v41_v12 = vld [vmem:[%s1115_s2 + $0x30] sm:$0xff] }
   0x4   :  { %68 = vmatpush.msra.mxu0 %v45_v2  ;;  %v75_v7 = vld [vmem:[%s1113_s5] sm:$0xff]  ;;  %v36_v11 = vld [vmem:[%s1115_s2 + $0x8] sm:$0xff]  ;;  %v37_v13 = vld [vmem:[%s1115_s2 + $0x10] sm:$0xff]  ;;  %v150_v31 = vadd.s32 1, %v864_v28  ;;  %v148_v33 = vmul.u32 8, %v864_v28  ;;  %v172_v38 = vadd.s32 1, %v147_v32 }
   0x5   :  { %116 = vmatpush.msra.mxu1 %v77_v3  ;;  %667 = vmatpush.msra.mxu2 %v77_v3  ;;  %v26_v8 = vld [vmem:[%s1114_s0] sm:$0xff]  ;;  %v42_v14 = vld [vmem:[%s1115_s2 + $0x38] sm:$0xff]  ;;  %v163_v39 = vmul.u32 8, %v147_v32  ;;  %v157_v41 = vadd.s32 16, %v864_v28  ;;  %v158_v42 = vadd.s32 24, %v864_v28  ;;  %v159_v46 = vadd.s32 32, %v864_v28 }
   0x6   :  { %69 = vmatpush.msra.mxu0 %v44_v4  ;;  %v35_v9 = vld [vmem:[%s1115_s2] sm:$0xff]  ;;  %v38_v15 = vld [vmem:[%s1115_s2 + $0x18] sm:$0xff]  ;;  %v151_v34 = vmul.u32 8, %v150_v31  ;;  %vm149_vm1 = vcmp.ge.s32.totalorder %v147_v32, %v148_v33  ;;  %v173_v40 = vmul.u32 8, %v172_v38  ;;  %v160_v48 = vadd.s32 40, %v864_v28  ;;  %v32_v0 = vld [vmem:[%s1118_s1 + $0x28] sm:$0xff] }
   0x7   :  { %117 = vmatpush.msra.mxu1 %v76_v5  ;;  %668 = vmatpush.msra.mxu2 %v76_v5  ;;  %v39_v16 = vld [vmem:[%s1115_s2 + $0x20] sm:$0xff]  ;;  %s737_s2 = smov 32   ;;  %vm166_vm5 = vcmp.ge.s32.totalorder %v157_v41, %v163_v39  ;;  %vm167_vm9 = vcmp.ge.s32.totalorder %v158_v42, %v163_v39  ;;  %vm164_vm11 = vcmp.ge.s32.totalorder %v864_v28, %v163_v39  ;;  %v156_v50 = vadd.s32 8, %v864_v28  ;;  %v29_v2 = vld [vmem:[%s1118_s1 + $0x10] sm:$0xff]  ;;  %v34_v3 = vld [vmem:[%s1118_s1 + $0x38] sm:$0xff] }
   0x8   :  { %70 = vmatpush.msra.mxu0 %v43_v6  ;;  %v695_v17 = vld [vmem:[%s1116_s4] ss:$0 sm:$0xff]  ;;  %vm152_vm2 = vcmp.lt.s32.totalorder %v147_v32, %v151_v34  ;;  %vm176_vm6 = vcmp.lt.s32.totalorder %v157_v41, %v173_v40  ;;  %vm177_vm10 = vcmp.lt.s32.totalorder %v158_v42, %v173_v40  ;;  %vm174_vm12 = vcmp.lt.s32.totalorder %v864_v28, %v173_v40  ;;  %s739_s4 = smov 96   ;;  %v33_v4 = vld [vmem:[%s1118_s1 + $0x30] sm:$0xff]  ;;  %v30_v6 = vld [vmem:[%s1118_s1 + $0x18] sm:$0xff] }
   0x9   :  { %118 = vmatpush.msra.mxu1 %v75_v7  ;;  %629 = vmatmul.msk.f32.vlgmr.msra.gmra.mxu0 %vm51_vm0, %v26_v8  ;;  %v847_v18 = vld [vmem:[%s1117_s6] ss:$0 sm:$0xff]  ;;  %vm153_vm3 = vmand %vm149_vm1, %vm152_vm2  ;;  %vm168_vm15 = vcmp.ge.s32.totalorder %v159_v46, %v163_v39  ;;  %vm178_vm1 = vcmp.lt.s32.totalorder %v159_v46, %v173_v40  ;;  %v161_v51 = vadd.s32 48, %v864_v28  ;;  %v162_v54 = vadd.s32 56, %v864_v28  ;;  %v28_v8 = vld [vmem:[%s1118_s1 + $0x8] sm:$0xff] }
   0xa   :  { %630 = vmatmul.msk.f32.vlgmr.msra.gmra.mxu1 %vm51_vm0, %v35_v9  ;;  %669 = vmatpush.msra.mxu2 %v75_v7  ;;  %v881_v37 = vsel %vm153_vm3, 1.0, %v738_v36  ;;  %vm184_vm7 = vmand %vm166_vm5, %vm176_vm6  ;;  %vm169_vm3 = vcmp.ge.s32.totalorder %v160_v48, %v163_v39  ;;  %vm179_vm5 = vcmp.lt.s32.totalorder %v160_v48, %v173_v40  ;;  %v31_v5 = vld [vmem:[%s1118_s1 + $0x20] sm:$0xff] }
   0xb   :  { %635 = vmatmul.msk.f32.vlgmr.msra.gmra.mxu2 %vm51_vm0, %v40_v10  ;;  %v641_v43 = vsel %vm184_vm7, 1.0, %v738_v36  ;;  %vm182_vm13 = vmand %vm164_vm11, %vm174_vm12  ;;  %vm165_vm7 = vcmp.ge.s32.totalorder %v156_v50, %v163_v39  ;;  %vm170_vm11 = vcmp.ge.s32.totalorder %v161_v51, %v163_v39  ;;  %vm180_vm12 = vcmp.lt.s32.totalorder %v161_v51, %v173_v40  ;;  %v27_v7 = vld [vmem:[%s1118_s1] sm:$0xff]  ;;  %s740_s1 = smov 64  }
   0xc   :  { %vm185_vm14 = vmand %vm167_vm9, %vm177_vm10  ;;  %v639_v45 = vsel %vm182_vm13, 1.0, %v738_v36  ;;  %vm175_vm9 = vcmp.lt.s32.totalorder %v156_v50, %v173_v40 }
   0xd   :  { %v642_v47 = vsel %vm185_vm14, 1.0, %v738_v36  ;;  %vm186_vm2 = vmand %vm168_vm15, %vm178_vm1  ;;  %vm171_vm14 = vcmp.ge.s32.totalorder %v162_v54, %v163_v39  ;;  %vm181_vm15 = vcmp.lt.s32.totalorder %v162_v54, %v173_v40 }
   0xe   :  { %v643_v49 = vsel %vm186_vm2, 1.0, %v738_v36  ;;  %vm187_vm6 = vmand %vm169_vm3, %vm179_vm5 }
   0xf   :  { %vm183_vm10 = vmand %vm165_vm7, %vm175_vm9  ;;  %v644_v52 = vsel %vm187_vm6, 1.0, %v738_v36 }
  0x10   :  { %v640_v53 = vsel %vm183_vm10, 1.0, %v738_v36  ;;  %vm188_vm13 = vmand %vm170_vm11, %vm180_vm12 }
  0x11   :  { %v645_v55 = vsel %vm188_vm13, 1.0, %v738_v36  ;;  %vm189_vm1 = vmand %vm171_vm14, %vm181_vm15 }
  0x12   :  { %631 = vmatmul.msk.f32.gmra.mxu1 %vm51_vm0, %v36_v11  ;;  %v646_v56 = vsel %vm189_vm1, 1.0, %v738_v36 }
  0x13   :  { %636 = vmatmul.msk.f32.gmra.mxu2 %vm51_vm0, %v41_v12 }
  0x1a   :  { %632 = vmatmul.msk.f32.gmra.mxu1 %vm51_vm0, %v37_v13 }
  0x1b   :  { %637 = vmatmul.msk.f32.gmra.mxu2 %vm51_vm0, %v42_v14 }
  0x22   :  { %633 = vmatmul.msk.f32.gmra.mxu1 %vm51_vm0, %v38_v15 }
  0x2a   :  { %634 = vmatmul.msk.f32.gmra.mxu1 %vm51_vm0, %v39_v16 }
  0x86   :  { %v72_v19 = vpop.f32.mrf.mxu0 }
  0x87   :  { %v849_v20 = vpop.f32.mrf.mxu1  ;;  %v851_v21 = vadd.f32 %v695_v17, %v72_v19 }
  0x89   :  { %v256_v22 = vadd.f32 %v847_v18, %v851_v21 }
  0x8b   :  { %258 = vrot.lane.b32.xlu0 %v256_v22, %s737_s2 }
  0x8e   :  { %v858_v24 = vpop.f32.mrf.mxu2 }
  0x8f   :  { %v856_v23 = vpop.f32.mrf.mxu1 }
  0x96   :  { %v862_v26 = vpop.f32.mrf.mxu2 }
  0x97   :  { %v860_v25 = vpop.f32.mrf.mxu1 }
  0x9e   :  { %v868_v30 = vpop.f32.mrf.mxu2 }
  0x9f   :  { %v866_v29 = vpop.f32.mrf.mxu1  ;;  %219 = vmatpush.msrb.mxu2 %v868_v30 }
  0xa1   :  { %220 = vmatpush.msrb.mxu2 %v862_v26 }
  0xa3   :  { %221 = vmatpush.msrb.mxu2 %v858_v24 }
  0xa7   :  { %v875_v35 = vpop.f32.mrf.mxu1 }
  0xa8   :  { %222 = vmatpush.msrb.mxu2 %v875_v35 }
  0xaa   :  { %223 = vmatpush.msrb.mxu2 %v866_v29 }
  0xac   :  { %224 = vmatpush.msrb.mxu2 %v860_v25 }
  0xae   :  { %225 = vmatpush.msrb.mxu2 %v856_v23 }
  0xb0   :  { %226 = vmatpush.msrb.mxu2 %v849_v20 }
  0xb1   :  { %647 = vmatmul.msk.f32.vlgmr.msrb.gmra.mxu2 %vm207_vm4, %v881_v37 }
  0xfd   :  { %v259_v44 = vpop.permute.xlu0 %258 }
  0xfe   :  { %301 = vmatpush.msrb.mxu0 %v259_v44  ;;  %670 = vmatpush.msra.mxu3 %v259_v44 }
  0xff   :  { %651 = vmatmul.msk.f32.vlgmr.msra.gmra.mxu3 %vm261_vm8, %v641_v43  ;;  %649 = vmatmul.msk.f32.vlgmr.msrb.gmra.mxu0 %vm261_vm8, %v639_v45 }
 0x107   :  { %652 = vmatmul.msk.f32.gmra.mxu3 %vm261_vm8, %v642_v47  ;;  %650 = vmatmul.msk.f32.gmra.mxu0 %vm261_vm8, %v640_v53 }
 0x10f   :  { %653 = vmatmul.msk.f32.gmra.mxu3 %vm261_vm8, %v643_v49 }
 0x117   :  { %654 = vmatmul.msk.f32.gmra.mxu3 %vm261_vm8, %v644_v52 }
 0x11f   :  { %655 = vmatmul.msk.f32.gmra.mxu3 %vm261_vm8, %v645_v55 }
 0x127   :  { %656 = vmatmul.msk.f32.gmra.mxu3 %vm261_vm8, %v646_v56 }
 0x134   :  { %v228_v44 = vpop.f32.mrf.mxu2 }
 0x17c   :  { %v303_v61 = vpop.f32.mrf.mxu0 }
 0x182   :  { %v309_v57 = vpop.f32.mrf.mxu3 }
 0x184   :  { %v306_v1 = vpop.f32.mrf.mxu0 }
 0x18a   :  { %v312_v58 = vpop.f32.mrf.mxu3 }
 0x192   :  { %v315_v59 = vpop.f32.mrf.mxu3 }
 0x193   :  { %343 = vrot.lane.b32.xlu2 %v315_v59, %s739_s4 }
 0x19a   :  { %v318_v60 = vpop.f32.mrf.mxu3 }
 0x19b   :  { %341 = vrot.lane.b32.xlu2 %v312_v58, %s739_s4 }
 0x1a2   :  { %v321_v62 = vpop.f32.mrf.mxu3 }
 0x1a3   :  { %347 = vrot.lane.b32.xlu1 %v321_v62, %s739_s4  ;;  %335 = vrot.lane.b32.xlu2 %v303_v61, %s739_s4 }
 0x1aa   :  { %v324_v63 = vpop.f32.mrf.mxu3 }
 0x1ab   :  { %345 = vrot.lane.b32.xlu1 %v318_v60, %s739_s4  ;;  %349 = vrot.lane.b32.xlu0 %v324_v63, %s739_s4 }
 0x1ac   :  { %537 = vrot.lane.b32.xlu2 %v32_v0, %s739_s4 }
 0x1b3   :  { %339 = vrot.lane.b32.xlu0 %v309_v57, %s739_s4  ;;  %337 = vrot.lane.b32.xlu1 %v306_v1, %s739_s4 }
 0x1b4   :  { %531 = vrot.lane.b32.xlu2 %v29_v2, %s739_s4 }
 0x1bb   :  { %541 = vrot.lane.b32.xlu0 %v34_v3, %s739_s4  ;;  %539 = vrot.lane.b32.xlu1 %v33_v4, %s739_s4 }
 0x1c3   :  { %535 = vrot.lane.b32.xlu0 %v31_v5, %s739_s4  ;;  %533 = vrot.lane.b32.xlu1 %v30_v6, %s739_s4 }
 0x1cb   :  { %527 = vrot.lane.b32.xlu1 %v27_v7, %s739_s4  ;;  %529 = vrot.lane.b32.xlu0 %v28_v8, %s739_s4 }
 0x1ed   :  { %v344_v9 = vpop.permute.xlu2 %343 }
 0x1ee   :  { %v363_v10 = vadd.f32 %v344_v9, %v875_v35 }
 0x1f0   :  { %v661_v12 = vmul.f32 -1.442695, %v363_v10 }
 0x1f2   :  { %697 = vpow2.f32 %v661_v12 }
 0x1f5   :  { %v342_v11 = vpop.permute.xlu2 %341 }
 0x1f6   :  { %v362_v13 = vadd.f32 %v342_v11, %v866_v29 }
 0x1f8   :  { %v698_v15 = vpop.eup %697  ;;  %v660_v16 = vmul.f32 -1.442695, %v362_v13 }
 0x1f9   :  { %v930_v19 = vadd.f32 1.0, %v698_v15 }
 0x1fa   :  { %699 = vpow2.f32 %v660_v16 }
 0x1fb   :  { %701 = vrcp.f32 %v930_v19  ;;  %vm464_vm2 = vweird.f32 %v930_v19  ;;  %v468_v61 = vand.u32 2147483647, %v930_v19 }
 0x1fd   :  { %v336_v14 = vpop.permute.xlu2 %335  ;;  %vm469_vm5 = vcmp.eq.f32.partialorder %v468_v61, 8.507059e+37 }
 0x1fe   :  { %v359_v17 = vadd.f32 %v336_v14, %v849_v20 }
 0x200   :  { %v657_v22 = vmul.f32 -1.442695, %v359_v17  ;;  %v700_v31 = vpop.eup %699 }
 0x201   :  { %v934_v33 = vpop.eup %701  ;;  %v936_v29 = vadd.f32 1.0, %v700_v31 }
 0x202   :  { %703 = vpow2.f32 %v657_v22  ;;  %v460_v39 = vmul.f32 %v934_v33, %v930_v19  ;;  %vm465_vm8 = vweird.f32 %v934_v33 }
 0x203   :  { %vm977_vm3 = vmor %vm464_vm2, %vm465_vm8  ;;  %v455_v0 = vand.u32 2147483648, %v936_v29  ;;  %v453_v9 = vand.u32 2147483647, %v936_v29  ;;  %vm449_vm12 = vweird.f32 %v936_v29 }
 0x204   :  { %v461_v45 = vsub.f32 1.0, %v460_v39 }
 0x205   :  { %v997_v13 = vor.u32 1.1754944e-38, %v455_v0 }
 0x206   :  { %v462_v50 = vmul.f32 %v934_v33, %v461_v45 }
 0x208   :  { %v704_v20 = vpop.eup %703 }
 0x209   :  { %v943_v42 = vadd.f32 1.0, %v704_v20 }
 0x20b   :  { %v408_v14 = vand.u32 2147483647, %v943_v42  ;;  %v410_v22 = vand.u32 2147483648, %v943_v42  ;;  %vm404_vm15 = vweird.f32 %v943_v42 }
 0x215   :  { %v348_v27 = vpop.permute.xlu1 %347 }
 0x216   :  { %v365_v28 = vadd.f32 %v348_v27, %v862_v26 }
 0x218   :  { %v663_v32 = vmul.f32 -1.442695, %v365_v28 }
 0x21a   :  { %705 = vpow2.f32 %v663_v32 }
 0x21b   :  { %707 = vrcp.f32 %v936_v29 }
 0x21d   :  { %v346_v34 = vpop.permute.xlu1 %345  ;;  %v350_v35 = vpop.permute.xlu0 %349 }
 0x21e   :  { %v364_v36 = vadd.f32 %v346_v34, %v858_v24  ;;  %v366_v38 = vadd.f32 %v350_v35, %v868_v30  ;;  %v231_v30 = vadd.f32 %v228_v44, %v851_v21 }
 0x220   :  { %v706_v26 = vpop.eup %705  ;;  %v662_v40 = vmul.f32 -1.442695, %v364_v36  ;;  %v664_v41 = vmul.f32 -1.442695, %v366_v38  ;;  %v960_v21 = vadd.f32 %v847_v18, %v231_v30  ;;  %v470_v18 = vand.u32 2147483648, %v930_v19 }
 0x221   :  { %v945_v43 = vadd.f32 1.0, %v706_v26  ;;  %v948_v24 = vpop.eup %707 }
 0x222   :  { %709 = vpow2.f32 %v662_v40  ;;  %v445_v54 = vmul.f32 %v948_v24, %v936_v29  ;;  %v471_v6 = vor.u32 1.1754944e-38, %v470_v18  ;;  %vm450_vm9 = vweird.f32 %v948_v24 }
 0x223   :  { %711 = vrcp.f32 %v945_v43  ;;  %v500_v16 = vand.u32 2147483648, %v945_v43  ;;  %vm494_vm7 = vweird.f32 %v945_v43  ;;  %v498_v35 = vand.u32 2147483647, %v945_v43 }
 0x224   :  { %713 = vpow2.f32 %v664_v41  ;;  %v446_v62 = vsub.f32 1.0, %v445_v54 }
 0x225   :  { %715 = vrcp.f32 %v943_v42  ;;  %v340_v46 = vpop.permute.xlu0 %339  ;;  %v338_v47 = vpop.permute.xlu1 %337  ;;  %v501_v30 = vor.u32 1.1754944e-38, %v500_v16  ;;  %vm499_vm8 = vcmp.eq.f32.partialorder %v498_v35, 8.507059e+37 }
 0x226   :  { %v361_v48 = vadd.f32 %v340_v46, %v860_v25  ;;  %v360_v49 = vadd.f32 %v338_v47, %v856_v23  ;;  %v463_v25 = vadd.f32 %v934_v33, %v462_v50  ;;  %v447_v8 = vmul.f32 %v948_v24, %v446_v62 }
 0x228   :  { %v710_v51 = vpop.eup %709  ;;  %v659_v52 = vmul.f32 -1.442695, %v361_v48  ;;  %v658_v53 = vmul.f32 -1.442695, %v360_v49  ;;  %v467_v1 = vsel %vm977_vm3, %v934_v33, %v463_v25  ;;  %v1011_v33 = vadd.f32 %v948_v24, %v447_v8  ;;  %v538_v48 = vpop.permute.xlu2 %537 }
 0x229   :  { %v957_v55 = vpop.eup %711  ;;  %v962_v56 = vadd.f32 1.0, %v710_v51  ;;  %v472_v12 = vsel %vm469_vm5, %v471_v6, %v467_v1 }
 0x22a   :  { %v714_v57 = vpop.eup %713  ;;  %717 = vpow2.f32 %v659_v52  ;;  %v490_v23 = vmul.f32 %v957_v55, %v945_v43  ;;  %vm495_vm6 = vweird.f32 %v957_v55 }
 0x22b   :  { %v968_v58 = vpop.eup %715  ;;  %719 = vrcp.f32 %v962_v56  ;;  %v971_v59 = vadd.f32 1.0, %v714_v57  ;;  %v483_v20 = vand.u32 2147483647, %v962_v56  ;;  %v485_v36 = vand.u32 2147483648, %v962_v56  ;;  %vm1020_vm10 = vmor %vm494_vm7, %vm495_vm6 }
 0x22c   :  { %721 = vpow2.f32 %v658_v53  ;;  %v491_v60 = vsub.f32 1.0, %v490_v23  ;;  %v400_v2 = vmul.f32 %v968_v58, %v943_v42  ;;  %vm479_vm14 = vweird.f32 %v962_v56 }
 0x22d   :  { %723 = vrcp.f32 %v971_v59  ;;  %v987_v3 = vpop.permute.xlu0 %541  ;;  %v990_v5 = vpop.permute.xlu1 %539  ;;  %v513_v44 = vand.u32 2147483647, %v971_v59  ;;  %v515_v43 = vand.u32 2147483648, %v971_v59  ;;  %vm509_vm1 = vweird.f32 %v971_v59 }
 0x22e   :  { %v492_v4 = vmul.f32 %v957_v55, %v491_v60  ;;  %725 = vtanh.f32 %v960_v21  ;;  %v401_v19 = vsub.f32 1.0, %v400_v2  ;;  %vm484_vm3 = vcmp.eq.f32.partialorder %v483_v20, 8.507059e+37 }
 0x22f   :  { %v486_v52 = vor.u32 1.1754944e-38, %v485_v36  ;;  %vm514_vm6 = vcmp.eq.f32.partialorder %v513_v44, 8.507059e+37  ;;  %v516_v23 = vor.u32 1.1754944e-38, %v515_v43  ;;  %vm1040_vm7 = vcmp.eq.f32.partialorder %v453_v9, 8.507059e+37 }
 0x230   :  { %v718_v7 = vpop.eup %717  ;;  %v493_v31 = vadd.f32 %v957_v55, %v492_v4  ;;  %v402_v41 = vmul.f32 %v968_v58, %v401_v19 }
 0x231   :  { %v720_v10 = vpop.eup %719  ;;  %v995_v11 = vadd.f32 1.0, %v718_v7 }
 0x232   :  { %v722_v15 = vpop.eup %721  ;;  %v475_v17 = vmul.f32 %v720_v10, %v962_v56  ;;  %vm480_vm11 = vweird.f32 %v720_v10  ;;  %v497_v45 = vsel %vm1020_vm10, %v957_v55, %v493_v31  ;;  %vm405_vm10 = vweird.f32 %v968_v58 }
 0x233   :  { %v724_v27 = vpop.eup %723  ;;  %727 = vrcp.f32 %v995_v11  ;;  %v1004_v28 = vadd.f32 1.0, %v722_v15  ;;  %vm481_vm2 = vmor %vm479_vm14, %vm480_vm11  ;;  %v502_v54 = vsel %vm499_vm8, %v501_v30, %v497_v45  ;;  %v403_v1 = vadd.f32 %v968_v58, %v402_v41 }
 0x234   :  { %v505_v32 = vmul.f32 %v724_v27, %v971_v59  ;;  %v476_v34 = vsub.f32 1.0, %v475_v17  ;;  %v1018_v38 = vpop.eup %725  ;;  %vm510_vm13 = vweird.f32 %v724_v27  ;;  %v557_v0 = vmul.f32 %v990_v5, %v502_v54 }
 0x235   :  { %729 = vrcp.f32 %v1004_v28  ;;  %v536_v50 = vpop.permute.xlu0 %535  ;;  %v534_v51 = vpop.permute.xlu1 %533  ;;  %vm511_vm5 = vmor %vm509_vm1, %vm510_vm13  ;;  %v440_v8 = vand.u32 2147483648, %v995_v11  ;;  %v425_v9 = vand.u32 2147483648, %v1004_v28  ;;  %v423_v16 = vand.u32 2147483647, %v1004_v28 }
 0x236   :  { %v506_v39 = vsub.f32 1.0, %v505_v32  ;;  %v477_v40 = vmul.f32 %v720_v10, %v476_v34  ;;  %v555_v60 = vmul.f32 %v536_v50, %v472_v12  ;;  %v438_v12 = vand.u32 2147483647, %v995_v11  ;;  %vm1058_vm13 = vmor %vm449_vm12, %vm450_vm9  ;;  %v532_v32 = vpop.permute.xlu2 %531 }
 0x237   :  { %v452_v17 = vsel %vm1058_vm13, %v948_v24, %v1011_v33  ;;  %vm1072_vm1 = vmor %vm404_vm15, %vm405_vm10  ;;  %vm1078_vm9 = vcmp.eq.f32.partialorder %v408_v14, 8.507059e+37  ;;  %vm434_vm12 = vweird.f32 %v995_v11  ;;  %vm419_vm15 = vweird.f32 %v1004_v28 }
 0x238   :  { %v507_v46 = vmul.f32 %v724_v27, %v506_v39  ;;  %v478_v47 = vadd.f32 %v720_v10, %v477_v40  ;;  %v407_v24 = vsel %vm1072_vm1, %v968_v58, %v403_v1  ;;  %v441_v14 = vor.u32 1.1754944e-38, %v440_v8 }
 0x239   :  { %v1033_v49 = vpop.eup %727  ;;  %v411_v33 = vor.u32 1.1754944e-38, %v410_v22  ;;  %v648_v54 = vmul.f32 -1.442695, %v960_v21 }
 0x23a   :  { %v508_v53 = vadd.f32 %v724_v27, %v507_v46  ;;  %v482_v55 = vsel %vm481_vm2, %v720_v10, %v478_v47  ;;  %v430_v56 = vmul.f32 %v1033_v49, %v995_v11  ;;  %vm435_vm11 = vweird.f32 %v1033_v49 }
 0x23b   :  { %v730_v57 = vpop.eup %729  ;;  %v487_v59 = vsel %vm484_vm3, %v486_v52, %v482_v55  ;;  %vm436_vm8 = vmor %vm434_vm12, %vm435_vm11  ;;  %v426_v11 = vor.u32 1.1754944e-38, %v425_v9  ;;  %vm439_vm3 = vcmp.eq.f32.partialorder %v438_v12, 8.507059e+37  ;;  %v412_v42 = vsel %vm1078_vm9, %v411_v33, %v407_v24 }
 0x23c   :  { %v512_v18 = vsel %vm511_vm5, %v724_v27, %v508_v53  ;;  %v556_v61 = vmul.f32 %v538_v48, %v487_v59  ;;  %v415_v62 = vmul.f32 %v730_v57, %v1004_v28  ;;  %v431_v2 = vsub.f32 1.0, %v430_v56 }
 0x23d   :  { %v517_v63 = vsel %vm514_vm6, %v516_v23, %v512_v18  ;;  %vm420_vm14 = vweird.f32 %v730_v57  ;;  %v528_v34 = vpop.permute.xlu1 %527  ;;  %v530_v35 = vpop.permute.xlu0 %529  ;;  %v457_v28 = vsel %vm1040_vm7, %v997_v13, %v452_v17  ;;  %vm424_vm5 = vcmp.eq.f32.partialorder %v423_v16, 8.507059e+37 }
 0x23e   :  { %v558_v4 = vmul.f32 %v987_v3, %v517_v63  ;;  %v680_v6 = vpack.i.bf16 %v555_v60, %v556_v61  ;;  %v416_v7 = vsub.f32 1.0, %v415_v62  ;;  %v432_v10 = vmul.f32 %v1033_v49, %v431_v2  ;;  %vm421_vm2 = vmor %vm419_vm15, %vm420_vm14 }
 0x23f   :  { %v554_v39 = vmul.f32 %v534_v51, %v457_v28  ;;  %v551_v40 = vmul.f32 %v528_v34, %v412_v42  ;;  %731 = vpow2.f32 %v648_v54 }
 0x240   :  { %v675_v15 = vpack.i.bf16 %v557_v0, %v558_v4  ;;  %681 = vrot.lane.b32.xlu0 %v680_v6, %s737_s2  ;;  %v417_v3 = vmul.f32 %v730_v57, %v416_v7  ;;  %v433_v27 = vadd.f32 %v1033_v49, %v432_v10 }
 0x242   :  { %676 = vrot.lane.b32.xlu2 %v675_v15, %s737_s2  ;;  %v418_v31 = vadd.f32 %v730_v57, %v417_v3  ;;  %v437_v58 = vsel %vm436_vm8, %v1033_v49, %v433_v27 }
 0x243   :  { %v442_v36 = vsel %vm439_vm3, %v441_v14, %v437_v58 }
 0x244   :  { %v422_v20 = vsel %vm421_vm2, %v730_v57, %v418_v31  ;;  %v553_v26 = vmul.f32 %v532_v32, %v442_v36 }
 0x245   :  { %v427_v22 = vsel %vm424_vm5, %v426_v11, %v422_v20  ;;  %v732_v55 = vpop.eup %731 }
 0x246   :  { %v552_v41 = vmul.f32 %v530_v35, %v427_v22  ;;  %v685_v44 = vpack.i.bf16 %v553_v26, %v554_v39  ;;  %v239_v56 = vadd.f32 1.0, %v732_v55 }
 0x248   :  { %v690_v43 = vpack.i.bf16 %v551_v40, %v552_v41  ;;  %612 = vrot.lane.b32.xlu0 %v1018_v38, %s740_s1  ;;  %686 = vrot.lane.b32.xlu1 %v685_v44, %s737_s2  ;;  %733 = vrcp.f32 %v239_v56  ;;  %v251_v60 = vand.u32 2147483648, %v239_v56  ;;  %vm245_vm7 = vweird.f32 %v239_v56 }
 0x249   :  { %v249_v61 = vand.u32 2147483647, %v239_v56 }
 0x24a   :  { %691 = vrot.lane.b32.xlu2 %v690_v43, %s737_s2  ;;  %v252_v0 = vor.u32 1.1754944e-38, %v251_v60 }
 0x24b   :  { %vm250_vm11 = vcmp.eq.f32.partialorder %v249_v61, 8.507059e+37 }
 0x24e   :  { %v734_v57 = vpop.eup %733 }
 0x24f   :  { %v241_v23 = vmul.f32 %v734_v57, %v239_v56  ;;  %vm246_vm6 = vweird.f32 %v734_v57 }
 0x250   :  { %vm247_vm10 = vmor %vm245_vm7, %vm246_vm6 }
 0x251   :  { %v242_v25 = vsub.f32 1.0, %v241_v23 }
 0x253   :  { %v243_v59 = vmul.f32 %v734_v57, %v242_v25 }
 0x255   :  { %v244_v18 = vadd.f32 %v734_v57, %v243_v59 }
 0x257   :  { %v248_v62 = vsel %vm247_vm10, %v734_v57, %v244_v18 }
 0x29c   :  { %v677_v13 = vpop.permute.xlu2 %676 }
 0x29d   :  { %v678_v45 = vunpack.i.l.bf16 %v677_v13  ;;  %v679_v30 = vunpack.i.h.bf16 %v677_v13 }
 0x29f   :  { %599 = vmatpush.msra.mxu0 %v678_v45 }
 0x2a1   :  { %600 = vmatpush.msra.mxu0 %v679_v30 }
 0x2a4   :  { %v692_v51 = vpop.permute.xlu2 %691 }
 0x2a5   :  { %v693_v38 = vunpack.i.l.bf16 %v692_v51  ;;  %v694_v53 = vunpack.i.h.bf16 %v692_v51 }
 0x2b2   :  { %v682_v46 = vpop.permute.xlu0 %681 }
 0x2b3   :  { %v683_v47 = vunpack.i.l.bf16 %v682_v46  ;;  %v684_v48 = vunpack.i.h.bf16 %v682_v46 }
 0x2b5   :  { %601 = vmatpush.msra.mxu0 %v683_v47 }
 0x2b7   :  { %602 = vmatpush.msra.mxu0 %v684_v48 }
 0x2ba   :  { %v687_v49 = vpop.permute.xlu1 %686  ;;  %v613_v63 = vpop.permute.xlu0 %612 }
 0x2bb   :  { %v688_v50 = vunpack.i.l.bf16 %v687_v49  ;;  %v689_v52 = vunpack.i.h.bf16 %v687_v49 }
 0x2bd   :  { %603 = vmatpush.msra.mxu0 %v688_v50 }
 0x2bf   :  { %604 = vmatpush.msra.mxu0 %v689_v52 }
 0x2c1   :  { %605 = vmatpush.msra.mxu0 %v693_v38 }
 0x2c3   :  { %606 = vmatpush.msra.mxu0 %v694_v53 }
 0x2c4   :  { %665 = vmatmul.msk.f32.vlgmr.msra.gmra.mxu0 %vm207_vm4, %v881_v37  ;;  %v253_v37 = vsel %vm250_vm11, %v252_v0, %v248_v62 }
 0x2c5   :  { %v615_v21 = vmul.f32 %v613_v63, %v253_v37 }
 0x341   :  { %v608_v1 = vpop.f32.mrf.mxu0 }
 0x342   :  { %v616_v2 = vadd.f32 %v615_v21, %v608_v1 }
 0x344   :  { %735 = vtanh.f32 %v616_v2 }
 0x34a   :  { %v736_v4 = vpop.eup %735 }
 0x34b   :  { %619 = vrot.lane.b32.xlu1 %v736_v4, %s737_s2 }
 0x3bd   :  { %v620_v6 = vpop.permute.xlu1 %619 }
 0x3be   :  { %v622_v7 = vmul.f32 %v620_v6, %v253_v37 }
 0x3c0   :  { %v623_v8 = vsel %vm51_vm0, %v616_v2, %v622_v7 }
 0x3c1   :  { %624 = vst.msk [vmem:[%s1119_s7] sm:$0xff] %vm207_vm4, %v623_v8 }

</bundles_post_ra>
